<compile_context>
chip_gen: v7x
topology: tpu7x:2x2x1
jax: 0.10.0
libtpu: 0.0.40
codegen_flags: <defaults>
</compile_context>

<pallas_src>
import functools
import math
from typing import List

import jax
import jax.numpy as jnp
import numpy as np
from jax.experimental import pallas as pl
from jax.experimental.pallas import tpu as pltpu


def compute_shifts(bins_per_semitone: int, harmonics: List[float]) -> List[int]:
    return [int(round(12.0 * bins_per_semitone * math.log2(h))) for h in harmonics]


def _round_up(x: int, m: int) -> int:
    return ((x + m - 1) // m) * m


def _harmonic_stack_kernel(x_ref, o_ref, *, shifts, n_freqs, n_out):
    # x_ref block: (1, tT, F)      o_ref block: (1, H, tT, n_out)
    # All slice bounds below are static Python ints.
    tT = x_ref.shape[1]
    dtype = o_ref.dtype
    for h, s in enumerate(shifts):
        lo = max(0, s)                       # valid source range [lo, hi)
        hi = min(n_freqs, s + n_out)
        if hi <= lo:
            # Whole window outside the spectrogram -> all-zero channel.
            o_ref[0, h, :, :] = jnp.zeros((tT, n_out), dtype)
            continue
        dst_lo = lo - s                      # valid output column range
        dst_hi = hi - s
        if dst_lo > 0:                       # left zero fill (negative shift)
            o_ref[0, h, :, :dst_lo] = jnp.zeros((tT, dst_lo), dtype)
        # Per-channel lane-offset copy straight from the input tile to the
        # output block (no staging, one store per channel for in-bounds
        # harmonics -> right shape for v5e's single vst slot).
        o_ref[0, h, :, dst_lo:dst_hi] = x_ref[0, :, lo:hi]
        if dst_hi < n_out:                   # right zero fill (upper harmonic)
            o_ref[0, h, :, dst_hi:] = jnp.zeros((tT, n_out - dst_hi), dtype)


def harmonic_stacking(x, bins_per_semitone: int, harmonics: List[float],
                      n_output_freqs: int, *,
                      vmem_budget_bytes: int = 20 << 20,
                      max_time_tile: int = 2048):
    """x: (B, T, F) -> (B, len(harmonics), T, n_output_freqs)."""
    B, T, F = x.shape
    shifts = compute_shifts(bins_per_semitone, harmonics)
    H = len(shifts)
    n_out = int(n_output_freqs)

    itemsize = jnp.dtype(x.dtype).itemsize
    sublane = max(8, 32 // itemsize)          # 8 for f32, 16 for bf16, 32 for i8

    # --- Time-tile selection -------------------------------------------------
    # Double-buffered working set per time row: input tile + output tile.
    per_row_bytes = 2 * (F + H * n_out) * itemsize
    tT = max(sublane, vmem_budget_bytes // max(per_row_bytes, 1))
    tT = min(tT, max(sublane, max_time_tile))
    tT = (tT // sublane) * sublane            # sublane-aligned when tiling
    if tT >= T:
        tT = T                                # full-dim block is always legal
    grid_t = pl.cdiv(T, tT)
    # v7x megacore: expose >= 2 grid programs when possible.
    if B * grid_t < 2:
        half = _round_up(max(1, pl.cdiv(T, 2)), sublane)
        if half < T:
            tT = half
            grid_t = pl.cdiv(T, tT)

    kernel = functools.partial(_harmonic_stack_kernel,
                               shifts=tuple(shifts), n_freqs=F, n_out=n_out)

    return pl.pallas_call(
        kernel,
        out_shape=jax.ShapeDtypeStruct((B, H, T, n_out), x.dtype),
        grid=(B, grid_t),
        in_specs=[pl.BlockSpec((1, tT, F), lambda b, t: (b, t, 0))],
        out_specs=pl.BlockSpec((1, H, tT, n_out), lambda b, t: (b, 0, t, 0)),
        compiler_params=pltpu.CompilerParams(
            dimension_semantics=("parallel", "parallel"),
            vmem_limit_bytes=32 << 20),
    )(x)


def harmonic_stacking_ref(x, bins_per_semitone, harmonics, n_output_freqs):
    """Pure numpy reference mirroring the PyTorch forward exactly."""
    shifts = compute_shifts(bins_per_semitone, harmonics)
    x = np.asarray(x)
    hcqt = []
    for shift in shifts:
        if shift == 0:
            cur = x
        elif shift > 0:
            cur = np.pad(x[:, :, shift:], ((0, 0), (0, 0), (0, shift)))
        else:
            cur = np.pad(x[:, :, :shift], ((0, 0), (0, 0), (-shift, 0)))
        hcqt.append(cur)
    hcqt = np.stack(hcqt, axis=1)
    return hcqt[:, :, :, :n_output_freqs]


if __name__ == "__main__":
    # --- Test 1: module-default-ish config, small deterministic input -------
    bins_per_semitone = 1
    harmonics = [0.5, 1.0, 2.0, 3.0]          # shifts -> [-12, 0, 12, 19]
    n_output_freqs = 32
    B, T, F = 2, 8, 64
    key = jax.random.PRNGKey(0)
    x = jax.random.normal(key, (B, T, F), dtype=jnp.float32)

    out = harmonic_stacking(x, bins_per_semitone, harmonics, n_output_freqs)
    out = jax.block_until_ready(out)
    ref = harmonic_stacking_ref(np.asarray(x), bins_per_semitone, harmonics,
                                n_output_freqs)
    assert out.shape == (B, len(harmonics), T, n_output_freqs), out.shape
    assert np.array_equal(np.asarray(out), ref), "mismatch (test 1)"

    # --- Test 2: ragged time tiles, multi-step grid, right-boundary harmonic -
    harmonics2 = [0.5, 1.0, 2.0, 3.0, 4.0, 5.0]   # shifts [-12,0,12,19,24,28]
    B2, T2, F2, n_out2 = 1, 20, 40, 32            # T2 % tile != 0, shift 28 > F2-n_out2
    x2 = jax.random.normal(jax.random.PRNGKey(0), (B2, T2, F2), dtype=jnp.float32)
    out2 = harmonic_stacking(x2, 1, harmonics2, n_out2, max_time_tile=8)
    out2 = jax.block_until_ready(out2)
    ref2 = harmonic_stacking_ref(np.asarray(x2), 1, harmonics2, n_out2)
    assert out2.shape == (B2, len(harmonics2), T2, n_out2), out2.shape
    assert np.array_equal(np.asarray(out2), ref2), "mismatch (test 2)"

    print("KERNEL_OK")
</pallas_src>

<mosaic_0001>
module attributes {stable_mosaic.version = 11 : i64} {
  func.func @_harmonic_stack_kernel(%arg0: i32, %arg1: i32, %arg2: memref<1x8x64xf32, #tpu.memory_space<vmem>>, %arg3: memref<1x4x8x32xf32, #tpu.memory_space<vmem>>) attributes {dimension_semantics = [#tpu.dimension_semantics<parallel>, #tpu.dimension_semantics<parallel>], iteration_bounds = array<i64: 2, 1>, scalar_prefetch = 0 : i64, scratch_operands = 0 : i64, tpu.core_type = #tpu.core_type<tc>, window_params = [{transform_indices = @transform_0, window_bounds = array<i64: 1, 8, 64>}, {transform_indices = @transform_1, window_bounds = array<i64: 1, 4, 8, 32>}]} {
    %cst = arith.constant 0.000000e+00 : f32
    %0 = vector.broadcast %cst : f32 to vector<8x12xf32>
    %c0 = arith.constant 0 : index
    %c0_0 = arith.constant 0 : index
    %c0_1 = arith.constant 0 : index
    %c0_2 = arith.constant 0 : index
    %1 = vector.load %arg3[%c0, %c0_0, %c0_1, %c0_2] : memref<1x4x8x32xf32, #tpu.memory_space<vmem>>, vector<1x1x8x12xf32>
    %2 = vector.shape_cast %1 : vector<1x1x8x12xf32> to vector<8x12xf32>
    %3 = vector.shape_cast %0 : vector<8x12xf32> to vector<1x1x8x12xf32>
    tpu.vector_store %arg3[%c0, %c0_0, %c0_1, %c0_2], %3 {strides = array<i32>} : memref<1x4x8x32xf32, #tpu.memory_space<vmem>>, vector<1x1x8x12xf32>,
    %c0_3 = arith.constant 0 : index
    %c0_4 = arith.constant 0 : index
    %c0_5 = arith.constant 0 : index
    %4 = vector.load %arg2[%c0_3, %c0_4, %c0_5] : memref<1x8x64xf32, #tpu.memory_space<vmem>>, vector<1x8x20xf32>
    %5 = vector.shape_cast %4 : vector<1x8x20xf32> to vector<8x20xf32>
    %c0_6 = arith.constant 0 : index
    %c0_7 = arith.constant 0 : index
    %c0_8 = arith.constant 0 : index
    %c12 = arith.constant 12 : index
    %6 = vector.load %arg3[%c0_6, %c0_7, %c0_8, %c12] : memref<1x4x8x32xf32, #tpu.memory_space<vmem>>, vector<1x1x8x20xf32>
    %7 = vector.shape_cast %6 : vector<1x1x8x20xf32> to vector<8x20xf32>
    %8 = vector.shape_cast %5 : vector<8x20xf32> to vector<1x1x8x20xf32>
    tpu.vector_store %arg3[%c0_6, %c0_7, %c0_8, %c12], %8 {strides = array<i32>} : memref<1x4x8x32xf32, #tpu.memory_space<vmem>>, vector<1x1x8x20xf32>,
    %c0_9 = arith.constant 0 : index
    %c0_10 = arith.constant 0 : index
    %c0_11 = arith.constant 0 : index
    %9 = vector.load %arg2[%c0_9, %c0_10, %c0_11] : memref<1x8x64xf32, #tpu.memory_space<vmem>>, vector<1x8x32xf32>
    %10 = vector.shape_cast %9 : vector<1x8x32xf32> to vector<8x32xf32>
    %c0_12 = arith.constant 0 : index
    %c1 = arith.constant 1 : index
    %c0_13 = arith.constant 0 : index
    %c0_14 = arith.constant 0 : index
    %11 = vector.load %arg3[%c0_12, %c1, %c0_13, %c0_14] : memref<1x4x8x32xf32, #tpu.memory_space<vmem>>, vector<1x1x8x32xf32>
    %12 = vector.shape_cast %11 : vector<1x1x8x32xf32> to vector<8x32xf32>
    %13 = vector.shape_cast %10 : vector<8x32xf32> to vector<1x1x8x32xf32>
    tpu.vector_store %arg3[%c0_12, %c1, %c0_13, %c0_14], %13 {strides = array<i32>} : memref<1x4x8x32xf32, #tpu.memory_space<vmem>>, vector<1x1x8x32xf32>,
    %c0_15 = arith.constant 0 : index
    %c0_16 = arith.constant 0 : index
    %c12_17 = arith.constant 12 : index
    %14 = vector.load %arg2[%c0_15, %c0_16, %c12_17] : memref<1x8x64xf32, #tpu.memory_space<vmem>>, vector<1x8x32xf32>
    %15 = vector.shape_cast %14 : vector<1x8x32xf32> to vector<8x32xf32>
    %c0_18 = arith.constant 0 : index
    %c2 = arith.constant 2 : index
    %c0_19 = arith.constant 0 : index
    %c0_20 = arith.constant 0 : index
    %16 = vector.load %arg3[%c0_18, %c2, %c0_19, %c0_20] : memref<1x4x8x32xf32, #tpu.memory_space<vmem>>, vector<1x1x8x32xf32>
    %17 = vector.shape_cast %16 : vector<1x1x8x32xf32> to vector<8x32xf32>
    %18 = vector.shape_cast %15 : vector<8x32xf32> to vector<1x1x8x32xf32>
    tpu.vector_store %arg3[%c0_18, %c2, %c0_19, %c0_20], %18 {strides = array<i32>} : memref<1x4x8x32xf32, #tpu.memory_space<vmem>>, vector<1x1x8x32xf32>,
    %c0_21 = arith.constant 0 : index
    %c0_22 = arith.constant 0 : index
    %c19 = arith.constant 19 : index
    %19 = vector.load %arg2[%c0_21, %c0_22, %c19] : memref<1x8x64xf32, #tpu.memory_space<vmem>>, vector<1x8x32xf32>
    %20 = vector.shape_cast %19 : vector<1x8x32xf32> to vector<8x32xf32>
    %c0_23 = arith.constant 0 : index
    %c3 = arith.constant 3 : index
    %c0_24 = arith.constant 0 : index
    %c0_25 = arith.constant 0 : index
    %21 = vector.load %arg3[%c0_23, %c3, %c0_24, %c0_25] : memref<1x4x8x32xf32, #tpu.memory_space<vmem>>, vector<1x1x8x32xf32>
    %22 = vector.shape_cast %21 : vector<1x1x8x32xf32> to vector<8x32xf32>
    %23 = vector.shape_cast %20 : vector<8x32xf32> to vector<1x1x8x32xf32>
    tpu.vector_store %arg3[%c0_23, %c3, %c0_24, %c0_25], %23 {strides = array<i32>} : memref<1x4x8x32xf32, #tpu.memory_space<vmem>>, vector<1x1x8x32xf32>,
    return
  }
  func.func @transform_0(%arg0: i32, %arg1: i32) -> (i32, i32, i32) {
    %c0_i32 = arith.constant 0 : i32
    %c0_i32_0 = arith.constant 0 : i32
    return %arg0, %arg1, %c0_i32 : i32, i32, i32
  }
  func.func @transform_1(%arg0: i32, %arg1: i32) -> (i32, i32, i32, i32) {
    %c0_i32 = arith.constant 0 : i32
    %c0_i32_0 = arith.constant 0 : i32
    %c0_i32_1 = arith.constant 0 : i32
    return %arg0, %c0_i32, %arg1, %c0_i32_0 : i32, i32, i32, i32
  }
}

</mosaic_0001>

<bundles_post_ra>
// kernel: tpu_custom_call.1
= control target key start
LH: loop header
LB: loop body
LE: loop exit
PB: predicated region body
PF: predicated region fallthrough
CT: control target
= control target key end

     0   :  { %6 = vsyncpa [#allocation3], 0  ;;  %s671_s0 = inlined_call_operand.hbm [shape: f32[2,8,64], index: 0, kind: input, shape index: {}]   ;;  %s672_s1 = inlined_call_operand.hbm [shape: f32[2,4,8,32], index: 1, kind: output, shape index: {}]  }
   0x1   :  { %8 = vsyncpa [#allocation3 + $0x1], 0 }
   0x2   :  { %9 = vsyncpa [#allocation4], 0 }
   0x3   :  { %11 = vsyncpa [#allocation4 + $0x1], 0  ;;  %s493_s6 = smov 0   ;;  %s495_s7 = smov 0  }
   0x4   :  { %s497_s8 = smov 0   ;;  %s499_s9 = smov 0  }
   0x5   :  { %s501_s10 = smov 0   ;;  %s503_s11 = smov 0  }
   0x6 LB: > { %s275_s12 = sadd.s32 4294967295, %s473_s11   ;;  %s276_s13 = sadd.s32 4294967294, %s473_s11   ;;  %s473_s11 = sphi %s503_s11, %s17_s11   ;;  %s469_s10 = sphi %s501_s10, %s688_s10   ;;  %s465_s9 = sphi %s499_s9, %s687_s9   ;;  %s461_s8 = sphi %s497_s8, %s686_s8   ;;  %s457_s7 = sphi %s495_s7, %s685_s7   ;;  %s453_s6 = sphi %s493_s6, %s684_s6  }
   0x7   : > { %s29_s14 = sadd.s32 1, %s469_s10  ;;  %s38_s15 = sadd.s32 1, %s461_s8 }
   0x8   : > { %p31_p0 = scmp.ge.s32.totalorder %s29_s14, 2  ;;  %p45_p1 = scmp.ne.s32.totalorder %s461_s8, %s457_s7 }
   0x9   : > { %p46_p2 = scmp.eq.s32.totalorder %s473_s11, 0  ;;  %p51_p3 = scmp.ne.s32.totalorder %s457_s7, %s453_s6 }
   0xa   : > { %s690_s14 = smov (%p31_p0, %s29_s14), 0  ;;  %p52_p5 = scmp.eq.s32.totalorder %s275_s12, 0 }
   0xb   : > { %p534_p4 = por %p46_p2, %p45_p1  ;;  %s33_s17 = ssub.s32 %s469_s10, %s690_s14 }
   0xc   : > { %p77_p6 = scmp.eq.s32.totalorder %s275_s12, 1  ;;  %p36_p7 = scmp.eq.s32.totalorder %s33_s17, 0 }
   0xd   : > { %p540_p8 = por %p52_p5, %p51_p3  ;;  %p83_p10 = scmp.eq.s32.totalorder %s276_s13, 1 }
   0xe   : > { %p544_p9 = por %p77_p6, %p45_p1  ;;  %p305_p13 = scmp.lt.s32.totalorder %s473_s11, 2 }
   0xf   : > { %s549_s20 = scalar_select %p36_p7, %s461_s8, %s38_s15  }
  0x10   : > { %s676_s19 = scalar_select %p544_p9, 1, 0 }
  0x11   : > { %p551_p11 = por %p83_p10, %p51_p3  ;;  %s103_s22 = sand.u32 1, %s461_s8  }
  0x12   : > { %s279_s23 = sshll.u32 %s103_s22, 3  ;;  %s280_s24 = sshll.u32 %s469_s10, 7 }
  0x13   : > { %s677_s21 = scalar_select %p551_p11, 1, 0 }
  0x14   : > { %s562_s27 = scalar_lea.hbm %s671_s0, %s280_s24  ;;  %s107_s28 = scalar_lea.vmem [#allocation2], %s279_s23 }
  0x15   : > { %s115_s29 = sshll.u32 %s107_s28, 4  ;;  %p568_p0 = pnand %p305_p13, %p534_p4  ;;  %s564_s29 = int_to_ptr.vmem [resolvable:$true] %s115_s29 }
  0x16   : > { %s104_s2 = scalar_lea.sflag [#allocation3], %s103_s22  ;;  %s361_s3 = scalar_lea.hbm %s562_s27, 128 }
  0x17   : > { %p362_p3 = scmp.ne.s32.totalorder %s562_s27, %s361_s3  ;;  %p363_p5 = pneg %p568_p0 }
  0x18   : > { %s366_s12 = scalar_lea.hbm %s671_s0, 256  ;;  %p367_p4 = scmp.lt.u32.totalorder %s562_s27, %s671_s0 }
  0x19   : > { %p364_p6 = pnand %p363_p5, %p362_p3  ;;  %p368_p10 = scmp.lt.u32.totalorder %s366_s12, %s361_s3 }
  0x1a   : > { %p370_p12 = scmp.lt.u32.totalorder %s361_s3, %s562_s27 }
  0x1b   : > { %p365_p7 = pneg %p364_p6  ;;  %p369_p13 = por %p368_p10, %p367_p4 }
  0x1d   : > { %p371_p1 = por %p370_p12, %p369_p13 }
  0x1f   : > { %p372_p2 = pnand %p371_p1, %p365_p7 }
  0x21   : > { %375 = shalt.err (!%p372_p2)
}
  0x22   : > { %s376_s16 = scalar_lea.vmem %s564_s29, 128  ;;  %s475_s17 = smov [#allocation2]  }
  0x23   : > { %p377_p3 = scmp.ne.s32.totalorder %s564_s29, %s376_s16  ;;  %s381_s22 = sshll.u32 %s475_s17, 4  ;;  %s382_s22 = int_to_ptr.vmem [resolvable:$false] %s381_s22 }
  0x24   : > { %s383_s23 = scalar_lea.vmem %s382_s22, 256  ;;  %p384_p9 = scmp.lt.s32.totalorder %s564_s29, %s382_s22 }
  0x25   : > { %p379_p6 = pnand %p377_p3, %p363_p5  ;;  %p385_p4 = scmp.lt.s32.totalorder %s383_s23, %s376_s16 }
  0x27   : > { %p380_p11 = pneg %p379_p6  ;;  %p386_p10 = por %p385_p4, %p384_p9 }
  0x29   : > { %p387_p12 = pnand %p386_p10, %p380_p11 }
  0x2b   : > { %390 = shalt.err (!%p387_p12)
}
  0x2c   : > { %300 = dma.hbm_to_vmem [thread:$0]  (!%p568_p0), %s562_s27, 128, %s564_s29, %s104_s2  }
  0x2d   : > { %p679_p1 = scmp.lt.s32.totalorder %s473_s11, 3  ;;  %p680_p2 = scmp.ge.s32.totalorder %s473_s11, 1 }
  0x2f   : > { %p121_p5 = pnand %p680_p2, %p679_p1 }
  0x30   : > { %s604_s24 = sand.u32 (!%p121_p5), 1, %s457_s7  }
  0x31   : > { %124 = sbr.rel (%p121_p5) target bundleno = 193 (0xc1), region = 24  ;;  %s282_s25 = sshll.u32 (!%p121_p5), %s604_s24, 3 }
  0x32   : > { %s127_s26 = scalar_lea.sflag (!%p121_p5), [#allocation3], %s604_s24  ;;  %s130_s28 = scalar_lea.vmem (!%p121_p5), [#allocation2], %s282_s25 }
  0x38   : > { %444 = dma.done.wait (%p540_p8), %s127_s26, 128  }
  0x39   : > { %446 = vsyncadd (%p540_p8), %s127_s26, 4294967168  ;;  %vm149_vm0 = vcmask 97280   ;;  %s283_s27 = sshll.u32 %s604_s24, 5  ;;  %v476_v0 = vmov 0.0   ;;  %vm160_vm1 = vcmask 261120   ;;  %v151_v1 = vld [vmem:[%s130_s28] sm:$0xff] }
  0x3a   : > { %s148_s29 = scalar_lea.vmem [#allocation5], %s283_s27  ;;  %s477_s30 = smov 12   ;;  %vm156_vm2 = vcmask 261216  }
  0x3b   : > { %150 = vst.msk [vmem:[%s148_s29] sm:$0xff] %vm149_vm0, %v476_v0  ;;  %153 = vrot.lane.b32.xlu0 %v151_v1, %s477_s30  ;;  %s478_s2 = smov 109   ;;  %s479_s3 = smov 116  }
  0x3c   : > { %171 = vrot.lane.b32.xlu1 %v151_v1, %s478_s2  ;;  %284 = vst.msk [vmem:[%s148_s29 + $0x8] sm:$0xff] %vm160_vm1, %v151_v1  ;;  %s191_s18 = sshll.u32 %s148_s29, 4  ;;  %s292_s4 = sshll.u32 %s465_s9, 9  ;;  %s616_s18 = int_to_ptr.vmem [resolvable:$true] %s191_s18 }
  0x3d   : > { %s621_s13 = scalar_lea.hbm %s672_s1, %s292_s4  ;;  %s177_s15 = scalar_lea.sflag [#allocation4], %s604_s24 }
  0x3e   : > { %s391_s9 = scalar_lea.vmem %s616_s18, 512  ;;  %p681_p9 = scmp.ne.s32.totalorder %s676_s19, 0 }
  0x3f   : > { %164 = vrot.lane.b32.xlu0 %v151_v1, %s479_s3  ;;  %p392_p8 = scmp.ne.s32.totalorder %s616_s18, %s391_s9  ;;  %s480_s16 = smov [#allocation5]  }
  0x40   : > { %s395_s17 = sshll.u32 %s480_s16, 4  ;;  %s396_s17 = int_to_ptr.vmem [resolvable:$false] %s395_s17 }
  0x41   : > { %p393_p11 = pnand %p392_p8, %p681_p9  ;;  %s397_s22 = scalar_lea.vmem %s396_s17, 1024 }
  0x42   : > { %p398_p7 = scmp.lt.s32.totalorder %s616_s18, %s396_s17  ;;  %p399_p13 = scmp.lt.s32.totalorder %s397_s22, %s391_s9 }
  0x43   : > { %p394_p0 = pneg %p393_p11 }
  0x44   : > { %p400_p3 = por %p399_p13, %p398_p7 }
  0x46   : > { %p401_p6 = pnand %p400_p3, %p394_p0 }
  0xad   : > { %v154_v2 = vpop.permute.xlu0 %153 }
  0xae   : > { %v172_v3 = vpop.permute.xlu1 %171  ;;  %157 = vst.msk [vmem:[%s148_s29] sm:$0xff] %vm156_vm2, %v154_v2 }
  0xaf   : > { %286 = vst.msk [vmem:[%s148_s29 + $0x18] sm:$0xff] %vm160_vm1, %v172_v3 }
  0xb1   : > { %v165_v4 = vpop.permute.xlu0 %164 }
  0xb2   : > { %285 = vst.msk [vmem:[%s148_s29 + $0x10] sm:$0xff] %vm160_vm1, %v165_v4 }
  0xb3   : > { %404 = shalt.err (!%p401_p6)
}
  0xb4   : > { %s405_s23 = scalar_lea.hbm %s621_s13, 512  ;;  %s409_s28 = scalar_lea.hbm %s672_s1, 1024 }
  0xb5   : > { %p406_p4 = scmp.ne.s32.totalorder %s621_s13, %s405_s23  ;;  %p410_p1 = scmp.lt.u32.totalorder %s621_s13, %s672_s1 }
  0xb6   : > { %p411_p2 = scmp.lt.u32.totalorder %s409_s28, %s405_s23  ;;  %p413_p8 = scmp.lt.u32.totalorder %s405_s23, %s621_s13 }
  0xb7   : > { %p407_p10 = pnand %p406_p4, %p681_p9 }
  0xb8   : > { %p412_p5 = por %p411_p2, %p410_p1 }
  0xb9   : > { %p408_p12 = pneg %p407_p10 }
  0xba   : > { %p414_p11 = por %p413_p8, %p412_p5 }
  0xbc   : > { %p415_p0 = pnand %p414_p11, %p408_p12 }
  0xbe   : > { %418 = shalt.err (!%p415_p0)
}
  0xbf   : > { %s481_s30 = smov 128   ;;  %s482_s2 = smov 8  }
  0xc0   : > { %295 = dma.vmem_to_hbm [thread:$0]  (%p681_p9), %s616_s18, 512, %s621_s13, %s177_s15, %s481_s30, %s481_s30, %s482_s2  }
  0xc1 PF: > { %s206_s3 = sand.u32 1, %s453_s6   ;;  %p682_p7 = scmp.ne.s32.totalorder %s677_s21, 0 }
  0xc2   : > { %p683_p13 = scmp.ge.s32.totalorder %s473_s11, 2  ;;  %s207_s4 = scalar_lea.sflag [#allocation4], %s206_s3 }
  0xc4   : > { %p302_p3 = pnand %p683_p13, %p682_p7 }
  0xc6   : > { %448 = dma.done.wait (!%p302_p3), %s207_s4, 512  }
  0xc7   : > { %450 = vsyncadd (!%p302_p3), %s207_s4, 4294966784  ;;  %s17_s11 = sadd.s32 1, %s473_s11   ;;  %s684_s6 = smov %s457_s7 }
  0xc8   : > { %p14_p6 = scmp.ge.s32.totalorder %s17_s11, 4   ;;  %s685_s7 = smov %s461_s8 }
  0xc9   : > { %s686_s8 = smov %s549_s20  ;;  %s687_s9 = smov %s469_s10 }
  0xca   : > { %s688_s10 = smov %s690_s14  ;;  %16 = sbr.rel (!%p14_p6) target bundleno = 6 (0x6), region = 72 }
  0xd1   :  { %212 = vsyncpa [#allocation3], 1 }
  0xd2   :  { %214 = vsyncpa [#allocation3 + $0x1], 1 }
  0xd3   :  { %215 = vsyncpa [#allocation4], 1 }
  0xd4   :  { %217 = vsyncpa [#allocation4 + $0x1], 1 }

</bundles_post_ra>
